<compile_context>
chip_gen: v5e
topology: v5e:2x2
jax: 0.10.0
libtpu: 0.0.40
codegen_flags: <defaults>
</compile_context>

<pallas_src>
import functools

import jax
import jax.numpy as jnp
from jax.experimental import pallas as pl
from jax.experimental.pallas import tpu as pltpu

BN_EPS = 1e-5


def netblock_kernel(x_ref, w_ref, gamma_ref, beta_ref, o_ref):
    # x_ref:     [B, IN]       (resident across all OUT tiles)
    # w_ref:     [IN, T_OUT]   (Linear weight tile, already transposed)
    # gamma_ref: [1, T_OUT]    (BN weight)
    # beta_ref:  [1, T_OUT]    (BN bias)
    # o_ref:     [B, T_OUT]
    x = x_ref[...]
    w = w_ref[...]

    # Linear (bias omitted: exactly cancelled by training-mode BN mean subtraction).
    y = jnp.dot(x, w, preferred_element_type=jnp.float32)  # [B, T_OUT], MXU

    # BatchNorm1d training-mode stats, one pass over y (biased variance).
    inv_b = 1.0 / y.shape[0]                               # static Python float
    s = jnp.sum(y, axis=0, keepdims=True)                  # [1, T_OUT]
    ss = jnp.sum(y * y, axis=0, keepdims=True)             # [1, T_OUT]
    mean = s * inv_b
    var = ss * inv_b - mean * mean

    # Fold BN affine into per-feature scale/shift (cheap [1, T_OUT] math),
    # then a single mul+add per output element, fused with ReLU.
    inv_std = jax.lax.rsqrt(var + BN_EPS)
    scale = gamma_ref[...] * inv_std
    shift = beta_ref[...] - mean * scale
    o_ref[...] = jnp.maximum(y * scale + shift, 0.0).astype(o_ref.dtype)


@functools.partial(jax.jit, static_argnames=("block_out",))
def netblock_forward(x, w_t, gamma, beta, *, block_out=None):
    """x: [B, IN] f32, w_t: [IN, OUT] f32, gamma/beta: [1, OUT] f32 -> [B, OUT] f32."""
    B, IN = x.shape
    OUT = w_t.shape[1]

    # Feature-axis tile: 128-multiple when possible (lane-dense stores, enables
    # double-buffered weight DMA and a parallelizable grid axis); otherwise whole OUT.
    if block_out is None:
        if OUT % 256 == 0:
            block_out = 256
        elif OUT % 128 == 0:
            block_out = 128
        else:
            block_out = OUT
    assert OUT % block_out == 0, "OUT must be divisible by block_out"
    grid = (OUT // block_out,)

    cost = pl.CostEstimate(
        flops=2 * B * IN * OUT,
        transcendentals=OUT,  # rsqrt per feature
        bytes_accessed=4 * (B * IN + IN * OUT + 2 * OUT + B * OUT),
    )

    return pl.pallas_call(
        netblock_kernel,
        out_shape=jax.ShapeDtypeStruct((B, OUT), jnp.float32),
        grid_spec=pl.GridSpec(
            grid=grid,
            in_specs=[
                pl.BlockSpec((B, IN), lambda j: (0, 0)),          # x resident
                pl.BlockSpec((IN, block_out), lambda j: (0, j)),  # W tile
                pl.BlockSpec((1, block_out), lambda j: (0, j)),   # gamma tile
                pl.BlockSpec((1, block_out), lambda j: (0, j)),   # beta tile
            ],
            out_specs=pl.BlockSpec((B, block_out), lambda j: (0, j)),
        ),
        compiler_params=pltpu.CompilerParams(
            # OUT tiles are fully independent (BN stats are per-feature) -> parallel.
            dimension_semantics=("parallel",),
        ),
        cost_estimate=cost,
    )(x, w_t, gamma, beta)


def _reference(x, w, b, gamma, beta):
    """Pure-JAX reference with PyTorch training-mode BN semantics (bias included)."""
    y = x @ w.T + b
    mean = jnp.mean(y, axis=0, keepdims=True)
    var = jnp.mean((y - mean) ** 2, axis=0, keepdims=True)
    return jnp.maximum((y - mean) / jnp.sqrt(var + BN_EPS) * gamma + beta, 0.0)


if __name__ == "__main__":
    key = jax.random.PRNGKey(0)

    def make_case(key, B, IN, OUT):
        k_x, k_w, k_b, k_g, k_bt = jax.random.split(key, 5)
        x = jax.random.normal(k_x, (B, IN), dtype=jnp.float32)
        bound = 1.0 / jnp.sqrt(IN)
        w = jax.random.uniform(k_w, (OUT, IN), minval=-bound, maxval=bound,
                               dtype=jnp.float32)              # PyTorch Linear weight [out, in]
        b = jax.random.uniform(k_b, (1, OUT), minval=-bound, maxval=bound,
                               dtype=jnp.float32)              # Linear bias (cancels under BN)
        gamma = jax.random.uniform(k_g, (1, OUT), minval=0.5, maxval=1.5,
                                   dtype=jnp.float32)          # BN weight
        beta = 0.1 * jax.random.normal(k_bt, (1, OUT), dtype=jnp.float32)  # BN bias
        return x, w, b, gamma, beta

    # Case 1: NetBlock(32, 64), batch=8 (OUT < 128 -> single full-OUT block, grid=(1,)).
    k1, k2 = jax.random.split(key)
    x, w, b, gamma, beta = make_case(k1, B=8, IN=32, OUT=64)
    out = netblock_forward(x, w.T, gamma, beta)
    out = jax.block_until_ready(out)
    ref = _reference(x, w, b, gamma, beta)
    assert jnp.allclose(out, ref, atol=1e-4, rtol=1e-4), "mismatch vs reference (case 1)"

    # Case 2: NetBlock(32, 256), batch=8 with block_out=128 to exercise the tiled/parallel
    # feature-axis grid path (grid=(2,), lane-dense 128-wide output tiles).
    x2, w2, b2, gamma2, beta2 = make_case(k2, B=8, IN=32, OUT=256)
    out2 = netblock_forward(x2, w2.T, gamma2, beta2, block_out=128)
    out2 = jax.block_until_ready(out2)
    ref2 = _reference(x2, w2, b2, gamma2, beta2)
    assert jnp.allclose(out2, ref2, atol=1e-4, rtol=1e-4), "mismatch vs reference (case 2)"

    print("KERNEL_OK")
</pallas_src>

<mosaic_0001>
module attributes {stable_mosaic.version = 11 : i64} {
  func.func @netblock_kernel(%arg0: i32, %arg1: memref<8x32xf32, #tpu.memory_space<vmem>>, %arg2: memref<32x64xf32, #tpu.memory_space<vmem>>, %arg3: memref<1x64xf32, #tpu.memory_space<vmem>>, %arg4: memref<1x64xf32, #tpu.memory_space<vmem>>, %arg5: memref<8x64xf32, #tpu.memory_space<vmem>>) attributes {dimension_semantics = [#tpu.dimension_semantics<parallel>], iteration_bounds = array<i64: 1>, scalar_prefetch = 0 : i64, scratch_operands = 0 : i64, tpu.core_type = #tpu.core_type<tc>, window_params = [{pipeline_mode = #tpu.pipeline_mode<synchronous>, transform_indices = @transform_0, window_bounds = array<i64: 8, 32>}, {transform_indices = @transform_1, window_bounds = array<i64: 32, 64>}, {transform_indices = @transform_2, window_bounds = array<i64: 1, 64>}, {transform_indices = @transform_3, window_bounds = array<i64: 1, 64>}, {transform_indices = @transform_4, window_bounds = array<i64: 8, 64>}]} {
    %c0 = arith.constant 0 : index
    %c0_0 = arith.constant 0 : index
    %0 = vector.load %arg1[%c0, %c0_0] : memref<8x32xf32, #tpu.memory_space<vmem>>, vector<8x32xf32>
    %c0_1 = arith.constant 0 : index
    %c0_2 = arith.constant 0 : index
    %1 = vector.load %arg2[%c0_1, %c0_2] : memref<32x64xf32, #tpu.memory_space<vmem>>, vector<32x64xf32>
    %cst = arith.constant dense<0.000000e+00> : vector<8x64xf32>
    %2 = tpu.matmul %0, %1, %cst {dimension_numbers = #tpu.dot_dimension_numbers<[1], [0], [0], [1], [0, 0, 1, 1], [], []>} : vector<8x32xf32>, vector<32x64xf32>, vector<8x64xf32> -> vector<8x64xf32>
    %cst_3 = arith.constant dense<0.000000e+00> : vector<64xf32>
    %3 = vector.multi_reduction <add>, %2, %cst_3 [0] : vector<8x64xf32> to vector<64xf32>
    %4 = vector.shape_cast %3 : vector<64xf32> to vector<1x64xf32>
    %5 = arith.mulf %2, %2 : vector<8x64xf32>
    %cst_4 = arith.constant dense<0.000000e+00> : vector<64xf32>
    %6 = vector.multi_reduction <add>, %5, %cst_4 [0] : vector<8x64xf32> to vector<64xf32>
    %7 = vector.shape_cast %6 : vector<64xf32> to vector<1x64xf32>
    %cst_5 = arith.constant 1.250000e-01 : f32
    %8 = vector.broadcast %cst_5 : f32 to vector<1x64xf32>
    %9 = arith.mulf %4, %8 : vector<1x64xf32>
    %cst_6 = arith.constant 1.250000e-01 : f32
    %10 = vector.broadcast %cst_6 : f32 to vector<1x64xf32>
    %11 = arith.mulf %7, %10 : vector<1x64xf32>
    %12 = arith.mulf %9, %9 : vector<1x64xf32>
    %13 = arith.subf %11, %12 : vector<1x64xf32>
    %cst_7 = arith.constant 9.99999974E-6 : f32
    %14 = vector.broadcast %cst_7 : f32 to vector<1x64xf32>
    %15 = arith.addf %13, %14 : vector<1x64xf32>
    %16 = math.rsqrt %15 : vector<1x64xf32>
    %c0_8 = arith.constant 0 : index
    %c0_9 = arith.constant 0 : index
    %17 = vector.load %arg3[%c0_8, %c0_9] : memref<1x64xf32, #tpu.memory_space<vmem>>, vector<1x64xf32>
    %18 = arith.mulf %17, %16 : vector<1x64xf32>
    %c0_10 = arith.constant 0 : index
    %c0_11 = arith.constant 0 : index
    %19 = vector.load %arg4[%c0_10, %c0_11] : memref<1x64xf32, #tpu.memory_space<vmem>>, vector<1x64xf32>
    %20 = arith.mulf %9, %18 : vector<1x64xf32>
    %21 = arith.subf %19, %20 : vector<1x64xf32>
    %22 = vector.broadcast %18 : vector<1x64xf32> to vector<8x64xf32>
    %23 = arith.mulf %2, %22 : vector<8x64xf32>
    %24 = vector.broadcast %21 : vector<1x64xf32> to vector<8x64xf32>
    %25 = arith.addf %23, %24 : vector<8x64xf32>
    %cst_12 = arith.constant 0.000000e+00 : f32
    %26 = vector.broadcast %cst_12 : f32 to vector<8x64xf32>
    %27 = arith.maximumf %25, %26 : vector<8x64xf32>
    %c0_13 = arith.constant 0 : index
    %c0_14 = arith.constant 0 : index
    %28 = vector.load %arg5[%c0_13, %c0_14] : memref<8x64xf32, #tpu.memory_space<vmem>>, vector<8x64xf32>
    tpu.vector_store %arg5[%c0_13, %c0_14], %27 {strides = array<i32>} : memref<8x64xf32, #tpu.memory_space<vmem>>, vector<8x64xf32>,
    return
  }
  func.func @transform_0(%arg0: i32) -> (i32, i32) {
    %c0_i32 = arith.constant 0 : i32
    %c0_i32_0 = arith.constant 0 : i32
    %c0_i32_1 = arith.constant 0 : i32
    return %c0_i32, %c0_i32_0 : i32, i32
  }
  func.func @transform_1(%arg0: i32) -> (i32, i32) {
    %c0_i32 = arith.constant 0 : i32
    %c0_i32_0 = arith.constant 0 : i32
    return %c0_i32, %arg0 : i32, i32
  }
  func.func @transform_2(%arg0: i32) -> (i32, i32) {
    %c0_i32 = arith.constant 0 : i32
    %c0_i32_0 = arith.constant 0 : i32
    return %c0_i32, %arg0 : i32, i32
  }
  func.func @transform_3(%arg0: i32) -> (i32, i32) {
    %c0_i32 = arith.constant 0 : i32
    %c0_i32_0 = arith.constant 0 : i32
    return %c0_i32, %arg0 : i32, i32
  }
  func.func @transform_4(%arg0: i32) -> (i32, i32) {
    %c0_i32 = arith.constant 0 : i32
    %c0_i32_0 = arith.constant 0 : i32
    return %c0_i32, %arg0 : i32, i32
  }
}

</mosaic_0001>

<bundles_post_ra>
// kernel: netblock_forward.1
= control target key start
LH: loop header
LB: loop body
LE: loop exit
PB: predicated region body
PF: predicated region fallthrough
CT: control target
= control target key end

     0   :  { %9 = vsyncpa [#allocation3], 0  ;;  %s275_s0 = inlined_call_operand.hbm [shape: f32[8,32], index: 0, kind: input, shape index: {}]   ;;  %s276_s1 = inlined_call_operand.hbm [shape: f32[32,64], index: 1, kind: input, shape index: {}]   ;;  %s277_s2 = inlined_call_operand.vmem [shape: f32[1,64], index: 2, kind: input, shape index: {}]   ;;  %s278_s3 = inlined_call_operand.vmem [shape: f32[1,64], index: 3, kind: input, shape index: {}]   ;;  %s279_s4 = inlined_call_operand.hbm [shape: f32[8,64], index: 4, kind: output, shape index: {}]  }
   0x1   :  { %10 = vsyncpa [#allocation6], 0 }
   0x2   :  { %11 = vsyncpa [#allocation4], 0  ;;  %s17_s17 = sshll.u32 %s275_s0, 4  ;;  %s227_s18 = smov [#allocation2]   ;;  %s18_s17 = int_to_ptr.hbm [resolvable:$true] %s17_s17 }
   0x3   :  { %s19_s19 = sshll.u32 %s227_s18, 4  ;;  %s27_s22 = sshll.u32 %s276_s1, 4  ;;  %s20_s19 = int_to_ptr.vmem [resolvable:$true] %s19_s19  ;;  %s28_s22 = int_to_ptr.hbm [resolvable:$true] %s27_s22 }
   0x4   :  { %22 = dma.hbm_to_vmem [thread:$0]  %s18_s17, 128, %s20_s19, [#allocation3]  }
   0x5   :  { %s228_s23 = smov [#allocation5]   ;;  %s229_s25 = smov 128  }
   0x6   :  { %s29_s24 = sshll.u32 %s228_s23, 4  ;;  %s230_s26 = smov 8   ;;  %s30_s24 = int_to_ptr.vmem [resolvable:$true] %s29_s24 }
   0x7   :  { %35 = dma.hbm_to_vmem [thread:$0]  %s28_s22, 512, %s30_s24, [#allocation6], %s229_s25, %s229_s25, %s230_s26  }
   0x8   :  { %221 = dma.done.wait [#allocation3], 128  }
   0x9   :  { %222 = vsyncadd [#allocation3], 4294967168 }
   0xa   :  { %223 = dma.done.wait [#allocation6], 512  }
   0xb   :  { %224 = vsyncadd [#allocation6], 4294966784  ;;  %v52_v0 = vld [vmem:[#allocation5 + $0x18] sm:$0xff]  ;;  %v51_v1 = vld [vmem:[#allocation5 + $0x10] sm:$0xff]  ;;  %vm53_vm0 = vcmask 261120   ;;  %vm77_vm1 = vcmask 523264  }
   0xc   :  { %69 = vmatpush.msra.mxu0 %v52_v0  ;;  %v50_v2 = vld [vmem:[#allocation5 + $0x8] sm:$0xff]  ;;  %v49_v3 = vld [vmem:[#allocation5] sm:$0xff]  ;;  %v48_v4 = vld [vmem:[#allocation2] sm:$0xff]  ;;  %s231_s29 = smov [#allocation7]   ;;  %s130_s7 = sshll.u32 %s279_s4, 4  ;;  %s131_s7 = int_to_ptr.hbm [resolvable:$true] %s130_s7 }
   0xd   :  { %v108_v32 = vld [vmem:[%s277_s2] sm:$0x1]  ;;  %s128_s30 = sshll.u32 %s231_s29, 4  ;;  %s129_s30 = int_to_ptr.vmem [resolvable:$true] %s128_s30 }
   0xe   :  { %70 = vmatpush.msra.mxu0 %v51_v1  ;;  %v110_v35 = vld [vmem:[%s278_s3] sm:$0x1] }
  0x10   :  { %71 = vmatpush.msra.mxu0 %v50_v2 }
  0x12   :  { %72 = vmatpush.msra.mxu0 %v49_v3 }
  0x13   :  { %141 = vmatmul.msk.f32.vlgmr.msra.gmra.mxu0 %vm53_vm0, %v48_v4 }
  0x90   :  { %v74_v5 = vpop.f32.mrf.mxu0 }
  0x91   :  { %v78_v6 = vsel %vm77_vm1, %v74_v5, 0.0  ;;  %v85_v7 = vmul.f32 %v74_v5, %v74_v5 }
  0x92   :  { %v79_v8 = vrot.slane %v78_v6, 4 }
  0x93   :  { %v86_v9 = vsel %vm77_vm1, %v85_v7, 0.0 }
  0x94   :  { %v80_v10 = vadd.f32 %v79_v8, %v78_v6  ;;  %v87_v11 = vrot.slane %v86_v9, 4 }
  0x96   :  { %v81_v12 = vrot.slane %v80_v10, 2  ;;  %v88_v13 = vadd.f32 %v87_v11, %v86_v9 }
  0x98   :  { %v82_v14 = vadd.f32 %v81_v12, %v80_v10  ;;  %v89_v15 = vrot.slane %v88_v13, 2 }
  0x9a   :  { %v83_v16 = vrot.slane %v82_v14, 1  ;;  %v90_v17 = vadd.f32 %v89_v15, %v88_v13 }
  0x9c   :  { %v84_v18 = vadd.f32 %v83_v16, %v82_v14  ;;  %v91_v19 = vrot.slane %v90_v17, 1 }
  0x9e   :  { %v92_v20 = vadd.f32 %v91_v19, %v90_v17  ;;  %v93_v21 = vmul.f32 0.125, %v84_v18 }
  0xa0   :  { %v94_v22 = vmul.f32 0.125, %v92_v20  ;;  %v95_v23 = vmul.f32 %v93_v21, %v93_v21 }
  0xa2   :  { %v96_v24 = vsub.f32 %v94_v22, %v95_v23 }
  0xa4   :  { %v97_v25 = vadd.f32 1e-05, %v96_v24 }
  0xa6   :  { %147 = vrsqrt.f32 %v97_v25  ;;  %vm104_vm3 = vweird.f32 %v97_v25 }
  0xac   :  { %v148_v26 = vpop.eup %147 }
  0xad   :  { %v99_v27 = vmul.f32 %v148_v26, %v97_v25  ;;  %vm105_vm2 = vweird.f32 %v148_v26 }
  0xae   :  { %vm106_vm4 = vmor %vm104_vm3, %vm105_vm2 }
  0xaf   :  { %v100_v28 = vmul.f32 %v148_v26, %v99_v27 }
  0xb1   :  { %v101_v29 = vmul.f32 0.5, %v100_v28 }
  0xb3   :  { %v102_v30 = vsub.f32 1.5, %v101_v29 }
  0xb5   :  { %v103_v31 = vmul.f32 %v148_v26, %v102_v30 }
  0xb7   :  { %v107_v33 = vsel %vm106_vm4, %v148_v26, %v103_v31 }
  0xb8   :  { %v109_v34 = vmul.f32 %v108_v32, %v107_v33 }
  0xba   :  { %v111_v36 = vmul.f32 %v109_v34, %v93_v21  ;;  %v114_v37 = vperm.slane %v109_v34, 0 }
  0xbc   :  { %v112_v38 = vsub.f32 %v110_v35, %v111_v36  ;;  %v116_v39 = vmul.f32 %v114_v37, %v74_v5 }
  0xbe   :  { %v118_v40 = vperm.slane %v112_v38, 0 }
  0xc0   :  { %v120_v41 = vadd.f32 %v118_v40, %v116_v39 }
  0xc2   :  { %v121_v42 = vmax.f32 %v120_v41, 0.0 }
  0xc4   :  { %122 = vst.msk [vmem:[#allocation7] sm:$0xff] %vm77_vm1, %v121_v42 }
  0xc5   :  { %133 = dma.vmem_to_hbm [thread:$0]  %s129_s30, 128, %s131_s7, [#allocation4]  }
  0xc6   :  { %225 = dma.done.wait [#allocation4], 128  }
  0xc7   :  { %226 = vsyncadd [#allocation4], 4294967168 }
  0xc8   :  { %138 = vsyncpa [#allocation3], 1 }
  0xc9   :  { %139 = vsyncpa [#allocation6], 1 }
  0xca   :  { %140 = vsyncpa [#allocation4], 1 }

</bundles_post_ra>
